<compile_context>
chip_gen: v5e
topology: v5e:2x2
jax: 0.10.0
libtpu: 0.0.40
codegen_flags: <defaults>
</compile_context>

<pallas_src>
import jax
import jax.numpy as jnp
from jax.experimental import pallas as pl
from jax.experimental.pallas import tpu as pltpu

BN_EPS = 1e-5      # torch.nn.BatchNorm1d default eps
NORM_EPS = 1e-12   # torch.nn.functional.normalize default eps


def _vmem_spec():
    return pl.BlockSpec(memory_space=pltpu.MemorySpace.VMEM)


# ----------------------------- fused kernel --------------------------------

def _make_kernel(rep_dim, hidden, proj, class_num):
    """Builds the fused BYEL forward kernel for the given (static) dims."""

    def kernel(x_ref, encw_ref, w1_ref, w2_ref, vech_ref, vecs_ref, wt_ref, out_ref):
        def mlp(h_in, w1, b1, g1, be1, w2, b2):
            # MLP = Linear -> BatchNorm1d (train-mode batch stats) -> ReLU -> Linear
            h = jnp.dot(h_in, w1, preferred_element_type=jnp.float32) + b1
            mean = jnp.mean(h, axis=0, keepdims=True)
            var = jnp.mean((h - mean) ** 2, axis=0, keepdims=True)   # biased, like torch BN train
            h = (h - mean) * jax.lax.rsqrt(var + BN_EPS) * g1 + be1
            h = jnp.maximum(h, 0.0)
            return jnp.dot(h, w2, preferred_element_type=jnp.float32) + b2

        # --- online encoder (backbone stand-in) --------------------------------
        # T.Normalize(mean,std) is folded into encw/enc_b at init; no per-call
        # elementwise normalize pass.
        # TODO(synk): ColorJitter/Grayscale/Flip/Blur/RandomResizedCrop have no
        # deterministic Pallas equivalent; image_one == image_two here.
        enc_b = vecs_ref[0:1, :rep_dim]
        rep = jnp.dot(x_ref[...], encw_ref[...],
                      preferred_element_type=jnp.float32) + enc_b          # (B, rep)

        # --- online projector MLP ----------------------------------------------
        proj_o = mlp(rep,
                     w1_ref[0:rep_dim, :],
                     vech_ref[0:1, :], vech_ref[1:2, :], vech_ref[2:3, :],
                     w2_ref[0:hidden, :],
                     vecs_ref[1:2, :proj])                                 # (B, proj)

        # --- online predictor MLP ----------------------------------------------
        pred = mlp(proj_o,
                   w1_ref[rep_dim:rep_dim + proj, :],
                   vech_ref[3:4, :], vech_ref[4:5, :], vech_ref[5:6, :],
                   w2_ref[hidden:2 * hidden, :],
                   vecs_ref[2:3, :proj])                                   # (B, proj)

        # --- BYOL loss -----------------------------------------------------------
        # Target encoder is a deepcopy of the online encoder (identical params at
        # init) and both views are identical, so target_proj_{one,two} == proj_o
        # (forward values; stop_gradient is value-identity).  label is None, so
        # emotion_vector == 0 and the predictions are unchanged.
        # TODO(synk): labelled path (emotion-vector gather + cross-entropy) and
        # EMA target update are not implemented.
        eps2 = jnp.float32(NORM_EPS * NORM_EPS)
        inv_p = jax.lax.rsqrt(jnp.maximum(
            jnp.sum(pred * pred, axis=-1, keepdims=True), eps2))
        inv_t = jax.lax.rsqrt(jnp.maximum(
            jnp.sum(proj_o * proj_o, axis=-1, keepdims=True), eps2))
        cos = jnp.sum((pred * inv_p) * (proj_o * inv_t), axis=-1, keepdims=True)
        per_sample = 2.0 * (2.0 - 2.0 * cos)                 # loss_one + loss_two
        byol = jnp.mean(per_sample, axis=0, keepdims=True)   # (1, 1)

        # --- orthogonality loss sum(|I - W^T W|) ---------------------------------
        # wt_ref holds W^T (class_num, proj): the contraction is on the lane axis,
        # MXU-native (no XLU transpose), and the operand pads to a single (8,128)
        # tile.  The regressor matmul + BatchNorm only feed the cross-entropy path
        # and are dead when label is None, so they are skipped entirely.
        w_t = wt_ref[...]                                                   # (C, P)
        wtw = jax.lax.dot_general(w_t, w_t, (((1,), (1,)), ((), ())),
                                  preferred_element_type=jnp.float32)       # (C, C)
        rows = jax.lax.broadcasted_iota(jnp.int32, (class_num, class_num), 0)
        cols = jax.lax.broadcasted_iota(jnp.int32, (class_num, class_num), 1)
        abs_diff = jnp.where(rows == cols, jnp.abs(1.0 - wtw), jnp.abs(wtw))
        lw = jnp.sum(jnp.sum(abs_diff, axis=1, keepdims=True),
                     axis=0, keepdims=True)                                 # (1, 1)

        # --- pack both scalars into one lane-dense output slab -------------------
        lane = jax.lax.broadcasted_iota(jnp.int32, (1, 128), 1)
        out_ref[...] = (jnp.where(lane == 0, byol, 0.0)
                        + jnp.where(lane == 1, lw, 0.0))

    return kernel


# ----------------------------- params & forward ----------------------------

def init_params(key, image_chw, rep_dim, proj_size, hidden_size, class_num):
    """Returns kernel-ready packed params (packing is done once, at init)."""
    C, H, W = image_chw
    flat_dim = C * H * W
    ks = jax.random.split(key, 6)

    def lin(k, fan_in, fan_out):
        bound = 1.0 / jnp.sqrt(jnp.float32(fan_in))
        return jax.random.uniform(k, (fan_in, fan_out), jnp.float32, -bound, bound)

    # raw (PyTorch-layout) parameters
    enc_w = lin(ks[0], flat_dim, rep_dim)
    pw1, pw2 = lin(ks[1], rep_dim, hidden_size), lin(ks[2], hidden_size, proj_size)
    qw1, qw2 = lin(ks[3], proj_size, hidden_size), lin(ks[4], hidden_size, proj_size)
    pb1 = jnp.zeros((hidden_size,), jnp.float32)
    pg1 = jnp.ones((hidden_size,), jnp.float32)
    pbe1 = jnp.zeros((hidden_size,), jnp.float32)
    pb2 = jnp.zeros((proj_size,), jnp.float32)
    qb1 = jnp.zeros((hidden_size,), jnp.float32)
    qg1 = jnp.ones((hidden_size,), jnp.float32)
    qbe1 = jnp.zeros((hidden_size,), jnp.float32)
    qb2 = jnp.zeros((proj_size,), jnp.float32)

    # orthogonal init for the regressor W (like nn.init.orthogonal_)
    w_raw = jax.random.normal(ks[5], (proj_size, class_num), jnp.float32)
    w_orth, _ = jnp.linalg.qr(w_raw)                      # (proj, class), columns orthonormal

    # --- fold T.Normalize into the encoder linear (once, constants) ---------
    mean = jnp.array([0.485, 0.456, 0.406], jnp.float32)
    std = jnp.array([0.229, 0.224, 0.225], jnp.float32)
    mean_flat = jnp.broadcast_to(mean.reshape(C, 1, 1), (C, H, W)).reshape(flat_dim)
    invstd_flat = jnp.broadcast_to((1.0 / std).reshape(C, 1, 1), (C, H, W)).reshape(flat_dim)
    enc_w_folded = enc_w * invstd_flat[:, None]
    enc_b_folded = -(mean_flat * invstd_flat) @ enc_w     # (rep_dim,)

    # --- pack the tiny per-feature vectors into two slabs -------------------
    vec_h = jnp.zeros((8, hidden_size), jnp.float32)
    vec_h = vec_h.at[0].set(pb1).at[1].set(pg1).at[2].set(pbe1)
    vec_h = vec_h.at[3].set(qb1).at[4].set(qg1).at[5].set(qbe1)

    small_w = max(rep_dim, proj_size)
    vec_s = jnp.zeros((8, small_w), jnp.float32)
    vec_s = vec_s.at[0, :rep_dim].set(enc_b_folded)
    vec_s = vec_s.at[1, :proj_size].set(pb2)
    vec_s = vec_s.at[2, :proj_size].set(qb2)

    return {
        "enc_w": enc_w_folded,                          # (flat, rep), Normalize folded in
        "w1": jnp.concatenate([pw1, qw1], axis=0),      # (rep + proj, hidden)
        "w2": jnp.concatenate([pw2, qw2], axis=0),      # (2*hidden, proj)
        "vec_h": vec_h,                                 # (8, hidden): p_b1,p_g1,p_be1,q_b1,q_g1,q_be1
        "vec_s": vec_s,                                 # (8, max(rep,proj)): enc_b,p_b2,q_b2
        "w_t": w_orth.T,                                # (class, proj): regressor W^T
        # regressor BatchNorm params are unused when label is None.
    }


def byel_forward(params, x):
    """Returns (byol_loss.mean(), loss_w.sum(), classification_loss) with label=None."""
    B = x.shape[0]
    x_flat = x.reshape(B, -1)

    rep_dim = params["enc_w"].shape[1]
    hidden = params["w1"].shape[1]
    proj = params["w2"].shape[1]
    class_num = params["w_t"].shape[0]

    kernel = _make_kernel(rep_dim, hidden, proj, class_num)
    out = pl.pallas_call(
        kernel,
        out_shape=jax.ShapeDtypeStruct((1, 128), jnp.float32),
        in_specs=[_vmem_spec()] * 7,
        out_specs=_vmem_spec(),
    )(x_flat, params["enc_w"], params["w1"], params["w2"],
      params["vec_h"], params["vec_s"], params["w_t"])

    byol_loss_mean = out[0, 0]
    loss_w_sum = out[0, 1]
    classification_loss = jnp.zeros((1,), jnp.float32)   # label is None
    return byol_loss_mean, loss_w_sum, classification_loss


if __name__ == "__main__":
    B, C, H, W = 4, 3, 16, 16
    rep_dim, proj_size, hidden_size, class_num = 128, 64, 256, 6

    key = jax.random.PRNGKey(0)
    kx, kp = jax.random.split(key)
    x = jax.random.normal(kx, (B, C, H, W), jnp.float32)
    params = init_params(kp, (C, H, W), rep_dim, proj_size, hidden_size, class_num)

    byol_loss, loss_w, cls_loss = jax.jit(byel_forward)(params, x)
    jax.block_until_ready((byol_loss, loss_w, cls_loss))
    print("KERNEL_OK")
</pallas_src>

<mosaic_0001>
module attributes {stable_mosaic.version = 11 : i64} {
  func.func @kernel(%arg0: memref<4x768xf32, #tpu.memory_space<vmem>>, %arg1: memref<768x128xf32, #tpu.memory_space<vmem>>, %arg2: memref<192x256xf32, #tpu.memory_space<vmem>>, %arg3: memref<512x64xf32, #tpu.memory_space<vmem>>, %arg4: memref<8x256xf32, #tpu.memory_space<vmem>>, %arg5: memref<8x128xf32, #tpu.memory_space<vmem>>, %arg6: memref<6x64xf32, #tpu.memory_space<vmem>>, %arg7: memref<1x128xf32, #tpu.memory_space<vmem>>) attributes {dimension_semantics = [], scalar_prefetch = 0 : i64, scratch_operands = 0 : i64, tpu.core_type = #tpu.core_type<tc>} {
    %c0 = arith.constant 0 : index
    %c0_0 = arith.constant 0 : index
    %0 = vector.load %arg5[%c0, %c0_0] : memref<8x128xf32, #tpu.memory_space<vmem>>, vector<1x128xf32>
    %c0_1 = arith.constant 0 : index
    %c0_2 = arith.constant 0 : index
    %1 = vector.load %arg0[%c0_1, %c0_2] : memref<4x768xf32, #tpu.memory_space<vmem>>, vector<4x768xf32>
    %c0_3 = arith.constant 0 : index
    %c0_4 = arith.constant 0 : index
    %2 = vector.load %arg1[%c0_3, %c0_4] : memref<768x128xf32, #tpu.memory_space<vmem>>, vector<768x128xf32>
    %cst = arith.constant dense<0.000000e+00> : vector<4x128xf32>
    %3 = tpu.matmul %1, %2, %cst {dimension_numbers = #tpu.dot_dimension_numbers<[1], [0], [0], [1], [0, 0, 1, 1], [], []>} : vector<4x768xf32>, vector<768x128xf32>, vector<4x128xf32> -> vector<4x128xf32>
    %4 = vector.broadcast %0 : vector<1x128xf32> to vector<4x128xf32>
    %5 = arith.addf %3, %4 : vector<4x128xf32>
    %c0_5 = arith.constant 0 : index
    %c0_6 = arith.constant 0 : index
    %6 = vector.load %arg2[%c0_5, %c0_6] : memref<192x256xf32, #tpu.memory_space<vmem>>, vector<128x256xf32>
    %c0_7 = arith.constant 0 : index
    %c0_8 = arith.constant 0 : index
    %7 = vector.load %arg4[%c0_7, %c0_8] : memref<8x256xf32, #tpu.memory_space<vmem>>, vector<1x256xf32>
    %c1 = arith.constant 1 : index
    %c0_9 = arith.constant 0 : index
    %8 = vector.load %arg4[%c1, %c0_9] : memref<8x256xf32, #tpu.memory_space<vmem>>, vector<1x256xf32>
    %c2 = arith.constant 2 : index
    %c0_10 = arith.constant 0 : index
    %9 = vector.load %arg4[%c2, %c0_10] : memref<8x256xf32, #tpu.memory_space<vmem>>, vector<1x256xf32>
    %c0_11 = arith.constant 0 : index
    %c0_12 = arith.constant 0 : index
    %10 = vector.load %arg3[%c0_11, %c0_12] : memref<512x64xf32, #tpu.memory_space<vmem>>, vector<256x64xf32>
    %c1_13 = arith.constant 1 : index
    %c0_14 = arith.constant 0 : index
    %11 = vector.load %arg5[%c1_13, %c0_14] : memref<8x128xf32, #tpu.memory_space<vmem>>, vector<1x64xf32>
    %cst_15 = arith.constant dense<0.000000e+00> : vector<4x256xf32>
    %12 = tpu.matmul %5, %6, %cst_15 {dimension_numbers = #tpu.dot_dimension_numbers<[1], [0], [0], [1], [0, 0, 1, 1], [], []>} : vector<4x128xf32>, vector<128x256xf32>, vector<4x256xf32> -> vector<4x256xf32>
    %13 = vector.broadcast %7 : vector<1x256xf32> to vector<4x256xf32>
    %14 = arith.addf %12, %13 : vector<4x256xf32>
    %cst_16 = arith.constant dense<0.000000e+00> : vector<256xf32>
    %15 = vector.multi_reduction <add>, %14, %cst_16 [0] : vector<4x256xf32> to vector<256xf32>
    %16 = vector.shape_cast %15 : vector<256xf32> to vector<1x256xf32>
    %cst_17 = arith.constant 4.000000e+00 : f32
    %17 = vector.broadcast %cst_17 : f32 to vector<1x256xf32>
    %18 = arith.divf %16, %17 : vector<1x256xf32>
    %19 = vector.broadcast %18 : vector<1x256xf32> to vector<4x256xf32>
    %20 = arith.subf %14, %19 : vector<4x256xf32>
    %21 = arith.mulf %20, %20 : vector<4x256xf32>
    %cst_18 = arith.constant dense<0.000000e+00> : vector<256xf32>
    %22 = vector.multi_reduction <add>, %21, %cst_18 [0] : vector<4x256xf32> to vector<256xf32>
    %23 = vector.shape_cast %22 : vector<256xf32> to vector<1x256xf32>
    %cst_19 = arith.constant 4.000000e+00 : f32
    %24 = vector.broadcast %cst_19 : f32 to vector<1x256xf32>
    %25 = arith.divf %23, %24 : vector<1x256xf32>
    %26 = vector.broadcast %18 : vector<1x256xf32> to vector<4x256xf32>
    %27 = arith.subf %14, %26 : vector<4x256xf32>
    %cst_20 = arith.constant 9.99999974E-6 : f32
    %28 = vector.broadcast %cst_20 : f32 to vector<1x256xf32>
    %29 = arith.addf %25, %28 : vector<1x256xf32>
    %30 = math.rsqrt %29 : vector<1x256xf32>
    %31 = vector.broadcast %30 : vector<1x256xf32> to vector<4x256xf32>
    %32 = arith.mulf %27, %31 : vector<4x256xf32>
    %33 = vector.broadcast %8 : vector<1x256xf32> to vector<4x256xf32>
    %34 = arith.mulf %32, %33 : vector<4x256xf32>
    %35 = vector.broadcast %9 : vector<1x256xf32> to vector<4x256xf32>
    %36 = arith.addf %34, %35 : vector<4x256xf32>
    %cst_21 = arith.constant 0.000000e+00 : f32
    %37 = vector.broadcast %cst_21 : f32 to vector<4x256xf32>
    %38 = arith.maximumf %36, %37 : vector<4x256xf32>
    %cst_22 = arith.constant dense<0.000000e+00> : vector<4x64xf32>
    %39 = tpu.matmul %38, %10, %cst_22 {dimension_numbers = #tpu.dot_dimension_numbers<[1], [0], [0], [1], [0, 0, 1, 1], [], []>} : vector<4x256xf32>, vector<256x64xf32>, vector<4x64xf32> -> vector<4x64xf32>
    %40 = vector.broadcast %11 : vector<1x64xf32> to vector<4x64xf32>
    %41 = arith.addf %39, %40 : vector<4x64xf32>
    %c128 = arith.constant 128 : index
    %c0_23 = arith.constant 0 : index
    %42 = vector.load %arg2[%c128, %c0_23] : memref<192x256xf32, #tpu.memory_space<vmem>>, vector<64x256xf32>
    %c3 = arith.constant 3 : index
    %c0_24 = arith.constant 0 : index
    %43 = vector.load %arg4[%c3, %c0_24] : memref<8x256xf32, #tpu.memory_space<vmem>>, vector<1x256xf32>
    %c4 = arith.constant 4 : index
    %c0_25 = arith.constant 0 : index
    %44 = vector.load %arg4[%c4, %c0_25] : memref<8x256xf32, #tpu.memory_space<vmem>>, vector<1x256xf32>
    %c5 = arith.constant 5 : index
    %c0_26 = arith.constant 0 : index
    %45 = vector.load %arg4[%c5, %c0_26] : memref<8x256xf32, #tpu.memory_space<vmem>>, vector<1x256xf32>
    %c256 = arith.constant 256 : index
    %c0_27 = arith.constant 0 : index
    %46 = vector.load %arg3[%c256, %c0_27] : memref<512x64xf32, #tpu.memory_space<vmem>>, vector<256x64xf32>
    %c2_28 = arith.constant 2 : index
    %c0_29 = arith.constant 0 : index
    %47 = vector.load %arg5[%c2_28, %c0_29] : memref<8x128xf32, #tpu.memory_space<vmem>>, vector<1x64xf32>
    %cst_30 = arith.constant dense<0.000000e+00> : vector<4x256xf32>
    %48 = tpu.matmul %41, %42, %cst_30 {dimension_numbers = #tpu.dot_dimension_numbers<[1], [0], [0], [1], [0, 0, 1, 1], [], []>} : vector<4x64xf32>, vector<64x256xf32>, vector<4x256xf32> -> vector<4x256xf32>
    %49 = vector.broadcast %43 : vector<1x256xf32> to vector<4x256xf32>
    %50 = arith.addf %48, %49 : vector<4x256xf32>
    %cst_31 = arith.constant dense<0.000000e+00> : vector<256xf32>
    %51 = vector.multi_reduction <add>, %50, %cst_31 [0] : vector<4x256xf32> to vector<256xf32>
    %52 = vector.shape_cast %51 : vector<256xf32> to vector<1x256xf32>
    %cst_32 = arith.constant 4.000000e+00 : f32
    %53 = vector.broadcast %cst_32 : f32 to vector<1x256xf32>
    %54 = arith.divf %52, %53 : vector<1x256xf32>
    %55 = vector.broadcast %54 : vector<1x256xf32> to vector<4x256xf32>
    %56 = arith.subf %50, %55 : vector<4x256xf32>
    %57 = arith.mulf %56, %56 : vector<4x256xf32>
    %cst_33 = arith.constant dense<0.000000e+00> : vector<256xf32>
    %58 = vector.multi_reduction <add>, %57, %cst_33 [0] : vector<4x256xf32> to vector<256xf32>
    %59 = vector.shape_cast %58 : vector<256xf32> to vector<1x256xf32>
    %cst_34 = arith.constant 4.000000e+00 : f32
    %60 = vector.broadcast %cst_34 : f32 to vector<1x256xf32>
    %61 = arith.divf %59, %60 : vector<1x256xf32>
    %62 = vector.broadcast %54 : vector<1x256xf32> to vector<4x256xf32>
    %63 = arith.subf %50, %62 : vector<4x256xf32>
    %cst_35 = arith.constant 9.99999974E-6 : f32
    %64 = vector.broadcast %cst_35 : f32 to vector<1x256xf32>
    %65 = arith.addf %61, %64 : vector<1x256xf32>
    %66 = math.rsqrt %65 : vector<1x256xf32>
    %67 = vector.broadcast %66 : vector<1x256xf32> to vector<4x256xf32>
    %68 = arith.mulf %63, %67 : vector<4x256xf32>
    %69 = vector.broadcast %44 : vector<1x256xf32> to vector<4x256xf32>
    %70 = arith.mulf %68, %69 : vector<4x256xf32>
    %71 = vector.broadcast %45 : vector<1x256xf32> to vector<4x256xf32>
    %72 = arith.addf %70, %71 : vector<4x256xf32>
    %cst_36 = arith.constant 0.000000e+00 : f32
    %73 = vector.broadcast %cst_36 : f32 to vector<4x256xf32>
    %74 = arith.maximumf %72, %73 : vector<4x256xf32>
    %cst_37 = arith.constant dense<0.000000e+00> : vector<4x64xf32>
    %75 = tpu.matmul %74, %46, %cst_37 {dimension_numbers = #tpu.dot_dimension_numbers<[1], [0], [0], [1], [0, 0, 1, 1], [], []>} : vector<4x256xf32>, vector<256x64xf32>, vector<4x64xf32> -> vector<4x64xf32>
    %76 = vector.broadcast %47 : vector<1x64xf32> to vector<4x64xf32>
    %77 = arith.addf %75, %76 : vector<4x64xf32>
    %78 = arith.mulf %77, %77 : vector<4x64xf32>
    %cst_38 = arith.constant dense<0.000000e+00> : vector<4xf32>
    %79 = vector.multi_reduction <add>, %78, %cst_38 [1] : vector<4x64xf32> to vector<4xf32>
    %80 = vector.shape_cast %79 : vector<4xf32> to vector<4x1xf32>
    %cst_39 = arith.constant 1.000000e-24 : f32
    %81 = vector.broadcast %cst_39 : f32 to vector<4x1xf32>
    %82 = arith.maximumf %80, %81 : vector<4x1xf32>
    %83 = math.rsqrt %82 : vector<4x1xf32>
    %84 = arith.mulf %41, %41 : vector<4x64xf32>
    %cst_40 = arith.constant dense<0.000000e+00> : vector<4xf32>
    %85 = vector.multi_reduction <add>, %84, %cst_40 [1] : vector<4x64xf32> to vector<4xf32>
    %86 = vector.shape_cast %85 : vector<4xf32> to vector<4x1xf32>
    %cst_41 = arith.constant 1.000000e-24 : f32
    %87 = vector.broadcast %cst_41 : f32 to vector<4x1xf32>
    %88 = arith.maximumf %86, %87 : vector<4x1xf32>
    %89 = math.rsqrt %88 : vector<4x1xf32>
    %90 = vector.broadcast %83 : vector<4x1xf32> to vector<4x64xf32>
    %91 = arith.mulf %77, %90 : vector<4x64xf32>
    %92 = vector.broadcast %89 : vector<4x1xf32> to vector<4x64xf32>
    %93 = arith.mulf %41, %92 : vector<4x64xf32>
    %94 = arith.mulf %91, %93 : vector<4x64xf32>
    %cst_42 = arith.constant dense<0.000000e+00> : vector<4xf32>
    %95 = vector.multi_reduction <add>, %94, %cst_42 [1] : vector<4x64xf32> to vector<4xf32>
    %96 = vector.shape_cast %95 : vector<4xf32> to vector<4x1xf32>
    %cst_43 = arith.constant 2.000000e+00 : f32
    %97 = vector.broadcast %cst_43 : f32 to vector<4x1xf32>
    %98 = arith.mulf %97, %96 : vector<4x1xf32>
    %cst_44 = arith.constant 2.000000e+00 : f32
    %99 = vector.broadcast %cst_44 : f32 to vector<4x1xf32>
    %100 = arith.subf %99, %98 : vector<4x1xf32>
    %cst_45 = arith.constant 2.000000e+00 : f32
    %101 = vector.broadcast %cst_45 : f32 to vector<4x1xf32>
    %102 = arith.mulf %101, %100 : vector<4x1xf32>
    %cst_46 = arith.constant dense<0.000000e+00> : vector<1xf32>
    %103 = vector.multi_reduction <add>, %102, %cst_46 [0] : vector<4x1xf32> to vector<1xf32>
    %104 = vector.shape_cast %103 : vector<1xf32> to vector<1x1xf32>
    %cst_47 = arith.constant 4.000000e+00 : f32
    %105 = vector.broadcast %cst_47 : f32 to vector<1x1xf32>
    %106 = arith.divf %104, %105 : vector<1x1xf32>
    %c0_48 = arith.constant 0 : index
    %c0_49 = arith.constant 0 : index
    %107 = vector.load %arg6[%c0_48, %c0_49] : memref<6x64xf32, #tpu.memory_space<vmem>>, vector<6x64xf32>
    %cst_50 = arith.constant dense<0.000000e+00> : vector<6x6xf32>
    %108 = tpu.matmul %107, %107, %cst_50 {dimension_numbers = #tpu.dot_dimension_numbers<[1], [1], [0], [0], [0, 0, 1, 0], [], []>} : vector<6x64xf32>, vector<6x64xf32>, vector<6x6xf32> -> vector<6x6xf32>
    %109 = tpu.iota {dimensions = array<i32: 0>} : vector<6x6xi32>
    %110 = tpu.iota {dimensions = array<i32: 1>} : vector<6x6xi32>
    %111 = arith.cmpi eq, %109, %110 : vector<6x6xi32>
    %cst_51 = arith.constant 1.000000e+00 : f32
    %112 = vector.broadcast %cst_51 : f32 to vector<6x6xf32>
    %113 = arith.subf %112, %108 : vector<6x6xf32>
    %114 = math.absf %113 : vector<6x6xf32>
    %115 = math.absf %108 : vector<6x6xf32>
    %116 = arith.select %111, %114, %115 : vector<6x6xi1>, vector<6x6xf32>
    %cst_52 = arith.constant dense<0.000000e+00> : vector<6xf32>
    %117 = vector.multi_reduction <add>, %116, %cst_52 [1] : vector<6x6xf32> to vector<6xf32>
    %118 = vector.shape_cast %117 : vector<6xf32> to vector<6x1xf32>
    %cst_53 = arith.constant dense<0.000000e+00> : vector<1xf32>
    %119 = vector.multi_reduction <add>, %118, %cst_53 [0] : vector<6x1xf32> to vector<1xf32>
    %120 = vector.shape_cast %119 : vector<1xf32> to vector<1x1xf32>
    %121 = tpu.iota {dimensions = array<i32: 1>} : vector<1x128xi32>
    %c0_i32 = arith.constant 0 : i32
    %122 = vector.broadcast %c0_i32 : i32 to vector<1x128xi32>
    %123 = arith.cmpi eq, %121, %122 : vector<1x128xi32>
    %cst_54 = arith.constant 0.000000e+00 : f32
    %124 = vector.shape_cast %106 : vector<1x1xf32> to vector<1x1xf32>
    %125 = vector.broadcast %124 : vector<1x1xf32> to vector<1x128xf32>
    %126 = vector.broadcast %cst_54 : f32 to vector<1x128xf32>
    %127 = arith.select %123, %125, %126 : vector<1x128xi1>, vector<1x128xf32>
    %c1_i32 = arith.constant 1 : i32
    %128 = vector.broadcast %c1_i32 : i32 to vector<1x128xi32>
    %129 = arith.cmpi eq, %121, %128 : vector<1x128xi32>
    %cst_55 = arith.constant 0.000000e+00 : f32
    %130 = vector.shape_cast %120 : vector<1x1xf32> to vector<1x1xf32>
    %131 = vector.broadcast %130 : vector<1x1xf32> to vector<1x128xf32>
    %132 = vector.broadcast %cst_55 : f32 to vector<1x128xf32>
    %133 = arith.select %129, %131, %132 : vector<1x128xi1>, vector<1x128xf32>
    %134 = arith.addf %127, %133 : vector<1x128xf32>
    %c0_56 = arith.constant 0 : index
    %c0_57 = arith.constant 0 : index
    %135 = vector.load %arg7[%c0_56, %c0_57] : memref<1x128xf32, #tpu.memory_space<vmem>>, vector<1x128xf32>
    tpu.vector_store %arg7[%c0_56, %c0_57], %134 {strides = array<i32>} : memref<1x128xf32, #tpu.memory_space<vmem>>, vector<1x128xf32>,
    return
  }
}

</mosaic_0001>

<bundles_post_ra>
// kernel: byel_forward.1
= control target key start
LH: loop header
LB: loop body
LE: loop exit
PB: predicated region body
PF: predicated region fallthrough
CT: control target
= control target key end

     0   :  { %12 = vsyncpa [#allocation3], 0  ;;  %s1570_s0 = inlined_call_operand.vmem [shape: f32[4,768], index: 0, kind: input, shape index: {}]   ;;  %s1571_s1 = inlined_call_operand.vmem [shape: f32[768,128], index: 1, kind: input, shape index: {}]   ;;  %s1572_s2 = inlined_call_operand.hbm [shape: f32[192,256], index: 2, kind: input, shape index: {}]   ;;  %s1573_s3 = inlined_call_operand.vmem [shape: f32[512,64], index: 3, kind: input, shape index: {}]   ;;  %s1574_s4 = inlined_call_operand.vmem [shape: f32[8,256], index: 4, kind: input, shape index: {}]   ;;  %s1575_s5 = inlined_call_operand.vmem [shape: f32[8,128], index: 5, kind: input, shape index: {}]   ;;  %s1576_s6 = inlined_call_operand.hbm [shape: f32[6,64], index: 6, kind: input, shape index: {}]   ;;  %s1577_s7 = inlined_call_operand.vmem [shape: f32[1,128], index: 7, kind: output, shape index: {}]  }
   0x1   :  { %s22_s26 = sshll.u32 %s1572_s2, 4  ;;  %s23_s26 = int_to_ptr.hbm [resolvable:$true] %s22_s26 }
   0x2   :  { %13 = vsyncpa [#allocation5], 0  ;;  %s946_s27 = smov [#allocation2]   ;;  %s42_s8 = sshll.u32 %s1576_s6, 4  ;;  %s43_s8 = int_to_ptr.hbm [resolvable:$true] %s42_s8 }
   0x3   :  { %s24_s28 = sshll.u32 %s946_s27, 4  ;;  %s947_s9 = smov 256   ;;  %s25_s28 = int_to_ptr.vmem [resolvable:$true] %s24_s28 }
   0x4   :  { %s948_s10 = smov 16   ;;  %s949_s11 = smov [#allocation4]  }
   0x5   :  { %30 = dma.hbm_to_vmem [thread:$0]  %s23_s26, 6144, %s25_s28, [#allocation3], %s947_s9, %s947_s9, %s948_s10  }
   0x6   :  { %s44_s12 = sshll.u32 %s949_s11, 4  ;;  %s45_s12 = int_to_ptr.vmem [resolvable:$true] %s44_s12 }
   0x7   :  { %47 = dma.hbm_to_vmem [thread:$0]  %s43_s8, 128, %s45_s12, [#allocation5]  }
   0x8   :  { %942 = dma.done.wait [#allocation3], 6144  }
   0x9   :  { %943 = vsyncadd [#allocation3], 4294961152 }
   0xa   :  { %944 = dma.done.wait [#allocation5], 128  }
   0xb   :  { %945 = vsyncadd [#allocation5], 4294967168  ;;  %v75_v0 = vld [vmem:[%s1571_s1 + $0x78] sm:$0xff]  ;;  %v74_v1 = vld [vmem:[%s1571_s1 + $0x70] sm:$0xff]  ;;  %vm412_vm0 = vcmask 1043456   ;;  %vm597_vm8 = vcmask 523264  }
   0xc   :  { %v91_v2 = vld [vmem:[%s1571_s1 + $0xf8] sm:$0xff]  ;;  %177 = vmatpush.msra.mxu0 %v75_v0  ;;  %v90_v3 = vld [vmem:[%s1571_s1 + $0xf0] sm:$0xff]  ;;  %v73_v4 = vld [vmem:[%s1571_s1 + $0x68] sm:$0xff]  ;;  %vm759_vm15 = vcmask 519168  }
   0xd   :  { %197 = vmatpush.msra.mxu1 %v91_v2  ;;  %v89_v5 = vld [vmem:[%s1571_s1 + $0xe8] sm:$0xff]  ;;  %v72_v6 = vld [vmem:[%s1571_s1 + $0x60] sm:$0xff]  ;;  %v71_v8 = vld [vmem:[%s1571_s1 + $0x58] sm:$0xff] }
   0xe   :  { %178 = vmatpush.msra.mxu0 %v74_v1  ;;  %v88_v7 = vld [vmem:[%s1571_s1 + $0xe0] sm:$0xff]  ;;  %v87_v9 = vld [vmem:[%s1571_s1 + $0xd8] sm:$0xff]  ;;  %v70_v10 = vld [vmem:[%s1571_s1 + $0x50] sm:$0xff] }
   0xf   :  { %198 = vmatpush.msra.mxu1 %v90_v3  ;;  %v107_v11 = vld [vmem:[%s1571_s1 + $0x178] sm:$0xff]  ;;  %v86_v12 = vld [vmem:[%s1571_s1 + $0xd0] sm:$0xff]  ;;  %v105_v15 = vld [vmem:[%s1571_s1 + $0x168] sm:$0xff] }
  0x10   :  { %179 = vmatpush.msra.mxu0 %v73_v4  ;;  %217 = vmatpush.msra.mxu2 %v107_v11  ;;  %v106_v13 = vld [vmem:[%s1571_s1 + $0x170] sm:$0xff]  ;;  %v123_v14 = vld [vmem:[%s1571_s1 + $0x1f8] sm:$0xff]  ;;  %v69_v17 = vld [vmem:[%s1571_s1 + $0x48] sm:$0xff] }
  0x11   :  { %199 = vmatpush.msra.mxu1 %v89_v5  ;;  %v122_v16 = vld [vmem:[%s1571_s1 + $0x1f0] sm:$0xff]  ;;  %v85_v18 = vld [vmem:[%s1571_s1 + $0xc8] sm:$0xff]  ;;  %237 = vmatpush.msra.mxu3 %v123_v14  ;;  %v104_v19 = vld [vmem:[%s1571_s1 + $0x160] sm:$0xff] }
  0x12   :  { %180 = vmatpush.msra.mxu0 %v72_v6  ;;  %218 = vmatpush.msra.mxu2 %v106_v13  ;;  %v121_v20 = vld [vmem:[%s1571_s1 + $0x1e8] sm:$0xff]  ;;  %v68_v21 = vld [vmem:[%s1571_s1 + $0x40] sm:$0xff]  ;;  %v103_v23 = vld [vmem:[%s1571_s1 + $0x158] sm:$0xff] }
  0x13   :  { %200 = vmatpush.msra.mxu1 %v88_v7  ;;  %v84_v22 = vld [vmem:[%s1571_s1 + $0xc0] sm:$0xff]  ;;  %238 = vmatpush.msra.mxu3 %v122_v16  ;;  %v67_v25 = vld [vmem:[%s1571_s1 + $0x38] sm:$0xff]  ;;  %v102_v27 = vld [vmem:[%s1571_s1 + $0x150] sm:$0xff] }
  0x14   :  { %181 = vmatpush.msra.mxu0 %v71_v8  ;;  %219 = vmatpush.msra.mxu2 %v105_v15  ;;  %v120_v24 = vld [vmem:[%s1571_s1 + $0x1e0] sm:$0xff]  ;;  %v83_v26 = vld [vmem:[%s1571_s1 + $0xb8] sm:$0xff]  ;;  %v66_v29 = vld [vmem:[%s1571_s1 + $0x30] sm:$0xff] }
  0x15   :  { %201 = vmatpush.msra.mxu1 %v87_v9  ;;  %239 = vmatpush.msra.mxu3 %v121_v20  ;;  %v119_v28 = vld [vmem:[%s1571_s1 + $0x1d8] sm:$0xff]  ;;  %v82_v30 = vld [vmem:[%s1571_s1 + $0xb0] sm:$0xff]  ;;  %v101_v31 = vld [vmem:[%s1571_s1 + $0x148] sm:$0xff] }
  0x16   :  { %182 = vmatpush.msra.mxu0 %v70_v10  ;;  %220 = vmatpush.msra.mxu2 %v104_v19  ;;  %v118_v32 = vld [vmem:[%s1571_s1 + $0x1d0] sm:$0xff]  ;;  %v65_v33 = vld [vmem:[%s1571_s1 + $0x28] sm:$0xff]  ;;  %v100_v35 = vld [vmem:[%s1571_s1 + $0x140] sm:$0xff] }
  0x17   :  { %202 = vmatpush.msra.mxu1 %v86_v12  ;;  %240 = vmatpush.msra.mxu3 %v120_v24  ;;  %v81_v34 = vld [vmem:[%s1571_s1 + $0xa8] sm:$0xff]  ;;  %v64_v37 = vld [vmem:[%s1571_s1 + $0x20] sm:$0xff]  ;;  %v99_v39 = vld [vmem:[%s1571_s1 + $0x138] sm:$0xff] }
  0x18   :  { %183 = vmatpush.msra.mxu0 %v69_v17  ;;  %221 = vmatpush.msra.mxu2 %v103_v23  ;;  %v117_v36 = vld [vmem:[%s1571_s1 + $0x1c8] sm:$0xff]  ;;  %v80_v38 = vld [vmem:[%s1571_s1 + $0xa0] sm:$0xff]  ;;  %v63_v41 = vld [vmem:[%s1571_s1 + $0x18] sm:$0xff] }
  0x19   :  { %203 = vmatpush.msra.mxu1 %v85_v18  ;;  %241 = vmatpush.msra.mxu3 %v119_v28  ;;  %v116_v40 = vld [vmem:[%s1571_s1 + $0x1c0] sm:$0xff]  ;;  %v79_v42 = vld [vmem:[%s1571_s1 + $0x98] sm:$0xff]  ;;  %v98_v43 = vld [vmem:[%s1571_s1 + $0x130] sm:$0xff] }
  0x1a   :  { %184 = vmatpush.msra.mxu0 %v68_v21  ;;  %222 = vmatpush.msra.mxu2 %v102_v27  ;;  %v115_v44 = vld [vmem:[%s1571_s1 + $0x1b8] sm:$0xff]  ;;  %v62_v45 = vld [vmem:[%s1571_s1 + $0x10] sm:$0xff]  ;;  %v97_v47 = vld [vmem:[%s1571_s1 + $0x128] sm:$0xff] }
  0x1b   :  { %204 = vmatpush.msra.mxu1 %v84_v22  ;;  %242 = vmatpush.msra.mxu3 %v118_v32  ;;  %v78_v46 = vld [vmem:[%s1571_s1 + $0x90] sm:$0xff]  ;;  %v61_v49 = vld [vmem:[%s1571_s1 + $0x8] sm:$0xff]  ;;  %v96_v51 = vld [vmem:[%s1571_s1 + $0x120] sm:$0xff] }
  0x1c   :  { %185 = vmatpush.msra.mxu0 %v67_v25  ;;  %223 = vmatpush.msra.mxu2 %v101_v31  ;;  %v114_v48 = vld [vmem:[%s1571_s1 + $0x1b0] sm:$0xff]  ;;  %v77_v50 = vld [vmem:[%s1571_s1 + $0x88] sm:$0xff]  ;;  %v60_v53 = vld [vmem:[%s1571_s1] sm:$0xff] }
  0x1d   :  { %205 = vmatpush.msra.mxu1 %v83_v26  ;;  %243 = vmatpush.msra.mxu3 %v117_v36  ;;  %v113_v52 = vld [vmem:[%s1571_s1 + $0x1a8] sm:$0xff]  ;;  %v76_v54 = vld [vmem:[%s1571_s1 + $0x80] sm:$0xff]  ;;  %v139_v56 = vld [vmem:[%s1571_s1 + $0x278] sm:$0xff] }
  0x1e   :  { %186 = vmatpush.msra.mxu0 %v66_v29  ;;  %224 = vmatpush.msra.mxu2 %v100_v35  ;;  %v58_v55 = vld [vmem:[%s1570_s0 + $0x8] sm:$0xff]  ;;  %v155_v57 = vld [vmem:[%s1571_s1 + $0x2f8] sm:$0xff]  ;;  %v57_v58 = vld [vmem:[%s1570_s0] sm:$0xff] }
  0x1f   :  { %206 = vmatpush.msra.mxu1 %v82_v30  ;;  %244 = vmatpush.msra.mxu3 %v116_v40  ;;  %162 = vst [vmem:[#allocation1 + $0x10] ss:$2 sm:$0xff] %v58_v55  ;;  %v95_v59 = vld [vmem:[%s1571_s1 + $0x118] sm:$0xff]  ;;  %v112_v60 = vld [vmem:[%s1571_s1 + $0x1a0] sm:$0xff]  ;;  %v138_v61 = vld [vmem:[%s1571_s1 + $0x270] sm:$0xff] }
  0x20   :  { %187 = vmatpush.msra.mxu0 %v65_v33  ;;  %225 = vmatpush.msra.mxu2 %v99_v39  ;;  %160 = vst [vmem:[#allocation1] ss:$2 sm:$0xff] %v57_v58  ;;  %v154_v62 = vld [vmem:[%s1571_s1 + $0x2f0] sm:$0xff]  ;;  %v111_v0 = vld [vmem:[%s1571_s1 + $0x198] sm:$0xff]  ;;  %v137_v2 = vld [vmem:[%s1571_s1 + $0x268] sm:$0xff] }
  0x21   :  { %207 = vmatpush.msra.mxu1 %v81_v34  ;;  %245 = vmatpush.msra.mxu3 %v115_v44  ;;  %v94_v63 = vld [vmem:[%s1571_s1 + $0x110] sm:$0xff]  ;;  %v153_v3 = vld [vmem:[%s1571_s1 + $0x2e8] sm:$0xff]  ;;  %v136_v6 = vld [vmem:[%s1571_s1 + $0x260] sm:$0xff] }
  0x22   :  { %188 = vmatpush.msra.mxu0 %v64_v37  ;;  %226 = vmatpush.msra.mxu2 %v98_v43  ;;  %v59_v1 = vld [vmem:[%s1570_s0 + $0x10] sm:$0xff]  ;;  %v93_v4 = vld [vmem:[%s1571_s1 + $0x108] sm:$0xff]  ;;  %v152_v7 = vld [vmem:[%s1571_s1 + $0x2e0] sm:$0xff] }
  0x23   :  { %208 = vmatpush.msra.mxu1 %v80_v38  ;;  %246 = vmatpush.msra.mxu3 %v114_v48  ;;  %164 = vst [vmem:[#allocation1 + $0x20] ss:$2 sm:$0xff] %v59_v1  ;;  %v110_v5 = vld [vmem:[%s1571_s1 + $0x190] sm:$0xff]  ;;  %v92_v8 = vld [vmem:[%s1571_s1 + $0x100] sm:$0xff]  ;;  %v109_v9 = vld [vmem:[%s1571_s1 + $0x188] sm:$0xff] }
  0x24   :  { %189 = vmatpush.msra.mxu0 %v63_v41  ;;  %227 = vmatpush.msra.mxu2 %v97_v47  ;;  %v135_v10 = vld [vmem:[%s1571_s1 + $0x258] sm:$0xff]  ;;  %v108_v13 = vld [vmem:[%s1571_s1 + $0x180] sm:$0xff]  ;;  %v134_v14 = vld [vmem:[%s1571_s1 + $0x250] sm:$0xff] }
  0x25   :  { %209 = vmatpush.msra.mxu1 %v79_v42  ;;  %247 = vmatpush.msra.mxu3 %v113_v52  ;;  %v151_v11 = vld [vmem:[%s1571_s1 + $0x2d8] sm:$0xff]  ;;  %v150_v15 = vld [vmem:[%s1571_s1 + $0x2d0] sm:$0xff]  ;;  %v133_v18 = vld [vmem:[%s1571_s1 + $0x248] sm:$0xff] }
  0x26   :  { %190 = vmatpush.msra.mxu0 %v62_v45  ;;  %228 = vmatpush.msra.mxu2 %v96_v51  ;;  %v167_v12 = vld.sshfl [vmem:[#allocation1 + $0x10] sm:$0xff pattern:$0x75316420]  ;;  %v168_v17 = vld.sshfl [vmem:[#allocation1 + $0x18] sm:$0xff pattern:$0x75316420] }
  0x27   :  { %210 = vmatpush.msra.mxu1 %v78_v46  ;;  %248 = vmatpush.msra.mxu3 %v112_v60  ;;  %v165_v16 = vld.sshfl [vmem:[#allocation1] sm:$0xff pattern:$0x75316420]  ;;  %v149_v19 = vld [vmem:[%s1571_s1 + $0x2c8] sm:$0xff]  ;;  %v327_v21 = vld [vmem:[#allocation2 + $0xf0] sm:$0xff] }
  0x28   :  { %191 = vmatpush.msra.mxu0 %v61_v49  ;;  %229 = vmatpush.msra.mxu2 %v95_v59  ;;  %v166_v20 = vld.sshfl [vmem:[#allocation1 + $0x8] sm:$0xff pattern:$0x75316420]  ;;  %v132_v22 = vld [vmem:[%s1571_s1 + $0x240] sm:$0xff]  ;;  %v131_v26 = vld [vmem:[%s1571_s1 + $0x238] sm:$0xff] }
  0x29   :  { %211 = vmatpush.msra.mxu1 %v77_v50  ;;  %249 = vmatpush.msra.mxu3 %v111_v0  ;;  %v148_v23 = vld [vmem:[%s1571_s1 + $0x2c0] sm:$0xff]  ;;  %v325_v25 = vld [vmem:[#allocation2 + $0xe0] sm:$0xff]  ;;  %v147_v27 = vld [vmem:[%s1571_s1 + $0x2b8] sm:$0xff] }
  0x2a   :  { %192 = vmatpush.msra.mxu0 %v60_v53  ;;  %230 = vmatpush.msra.mxu2 %v94_v63  ;;  %v328_v24 = vld [vmem:[#allocation2 + $0xf8] sm:$0xff]  ;;  %v326_v28 = vld [vmem:[#allocation2 + $0xe8] sm:$0xff]  ;;  %v323_v29 = vld [vmem:[#allocation2 + $0xd0] sm:$0xff] }
  0x2b   :  { %212 = vmatpush.msra.mxu1 %v76_v54  ;;  %250 = vmatpush.msra.mxu3 %v110_v5  ;;  %v130_v30 = vld [vmem:[%s1571_s1 + $0x230] sm:$0xff]  ;;  %v324_v32 = vld [vmem:[#allocation2 + $0xd8] sm:$0xff]  ;;  %v321_v33 = vld [vmem:[#allocation2 + $0xc0] sm:$0xff] }
  0x2c   :  { %257 = vmatpush.msrb.mxu0 %v139_v56  ;;  %231 = vmatpush.msra.mxu2 %v93_v4  ;;  %v146_v31 = vld [vmem:[%s1571_s1 + $0x2b0] sm:$0xff]  ;;  %v129_v34 = vld [vmem:[%s1571_s1 + $0x228] sm:$0xff]  ;;  %v319_v37 = vld [vmem:[#allocation2 + $0xb0] sm:$0xff] }
  0x2d   :  { %277 = vmatpush.msrb.mxu1 %v155_v57  ;;  %251 = vmatpush.msra.mxu3 %v109_v9  ;;  %v145_v35 = vld [vmem:[%s1571_s1 + $0x2a8] sm:$0xff]  ;;  %v322_v36 = vld [vmem:[#allocation2 + $0xc8] sm:$0xff]  ;;  %v128_v38 = vld [vmem:[%s1571_s1 + $0x220] sm:$0xff] }
  0x2e   :  { %258 = vmatpush.msrb.mxu0 %v138_v61  ;;  %232 = vmatpush.msra.mxu2 %v92_v8  ;;  %v144_v39 = vld [vmem:[%s1571_s1 + $0x2a0] sm:$0xff]  ;;  %v317_v41 = vld [vmem:[#allocation2 + $0xa0] sm:$0xff]  ;;  %v127_v42 = vld [vmem:[%s1571_s1 + $0x218] sm:$0xff] }
  0x2f   :  { %278 = vmatpush.msrb.mxu1 %v154_v62  ;;  %233 = vmatmul.f32.vlgmr.msra.gmra.mxu2 %v167_v12  ;;  %v320_v40 = vld [vmem:[#allocation2 + $0xb8] sm:$0xff]  ;;  %v143_v43 = vld [vmem:[%s1571_s1 + $0x298] sm:$0xff]  ;;  %v318_v44 = vld [vmem:[#allocation2 + $0xa8] sm:$0xff] }
  0x30   :  { %259 = vmatpush.msrb.mxu0 %v137_v2  ;;  %252 = vmatpush.msra.mxu3 %v108_v13  ;;  %v315_v45 = vld [vmem:[#allocation2 + $0x90] sm:$0xff]  ;;  %v126_v46 = vld [vmem:[%s1571_s1 + $0x210] sm:$0xff]  ;;  %v316_v48 = vld [vmem:[#allocation2 + $0x98] sm:$0xff] }
  0x31   :  { %279 = vmatpush.msrb.mxu1 %v153_v3  ;;  %193 = vmatmul.f32.vlgmr.msra.gmra.mxu0 %v165_v16  ;;  %v142_v47 = vld [vmem:[%s1571_s1 + $0x290] sm:$0xff]  ;;  %v313_v49 = vld [vmem:[#allocation2 + $0x80] sm:$0xff]  ;;  %v311_v53 = vld [vmem:[#allocation2 + $0x70] sm:$0xff] }
  0x32   :  { %260 = vmatpush.msrb.mxu0 %v136_v6  ;;  %253 = vmatmul.f32.vlgmr.msra.gmra.mxu3 %v168_v17  ;;  %v125_v50 = vld [vmem:[%s1571_s1 + $0x208] sm:$0xff]  ;;  %v314_v52 = vld [vmem:[#allocation2 + $0x88] sm:$0xff]  ;;  %v124_v54 = vld [vmem:[%s1571_s1 + $0x200] sm:$0xff] }
  0x33   :  { %280 = vmatpush.msrb.mxu1 %v152_v7  ;;  %372 = vmatpush.msrb.mxu2 %v327_v21  ;;  %v141_v51 = vld [vmem:[%s1571_s1 + $0x288] sm:$0xff]  ;;  %v140_v55 = vld [vmem:[%s1571_s1 + $0x280] sm:$0xff]  ;;  %v310_v60 = vld [vmem:[#allocation2 + $0x68] sm:$0xff] }
  0x34   :  { %261 = vmatpush.msrb.mxu0 %v135_v10  ;;  %213 = vmatmul.f32.vlgmr.msra.gmra.mxu1 %v166_v20  ;;  %v169_v56 = vld.sshfl [vmem:[#allocation1 + $0x20] sm:$0xff pattern:$0x75316420]  ;;  %v170_v57 = vld.sshfl [vmem:[#allocation1 + $0x28] sm:$0xff pattern:$0x75316420] }
  0x35   :  { %281 = vmatpush.msrb.mxu1 %v151_v11  ;;  %392 = vmatpush.msrb.mxu3 %v328_v24  ;;  %v312_v58 = vld [vmem:[#allocation2 + $0x78] sm:$0xff]  ;;  %v309_v59 = vld [vmem:[#allocation2 + $0x60] sm:$0xff]  ;;  %v307_v61 = vld [vmem:[#allocation2 + $0x50] sm:$0xff] }
  0x36   :  { %262 = vmatpush.msrb.mxu0 %v134_v14  ;;  %373 = vmatpush.msrb.mxu2 %v325_v25  ;;  %v308_v62 = vld [vmem:[#allocation2 + $0x58] sm:$0xff]  ;;  %v305_v63 = vld [vmem:[#allocation2 + $0x40] sm:$0xff]  ;;  %v306_v0 = vld [vmem:[#allocation2 + $0x48] sm:$0xff] }
  0x37   :  { %282 = vmatpush.msrb.mxu1 %v150_v15  ;;  %393 = vmatpush.msrb.mxu3 %v326_v28  ;;  %v303_v1 = vld [vmem:[#allocation2 + $0x30] sm:$0xff]  ;;  %v304_v2 = vld [vmem:[#allocation2 + $0x38] sm:$0xff]  ;;  %v301_v3 = vld [vmem:[#allocation2 + $0x20] sm:$0xff] }
  0x38   :  { %263 = vmatpush.msrb.mxu0 %v133_v18  ;;  %374 = vmatpush.msrb.mxu2 %v323_v29  ;;  %v302_v4 = vld [vmem:[#allocation2 + $0x28] sm:$0xff]  ;;  %v299_v5 = vld [vmem:[#allocation2 + $0x10] sm:$0xff]  ;;  %v300_v6 = vld [vmem:[#allocation2 + $0x18] sm:$0xff] }
  0x39   :  { %283 = vmatpush.msrb.mxu1 %v149_v19  ;;  %394 = vmatpush.msrb.mxu3 %v324_v32  ;;  %v297_v7 = vld [vmem:[#allocation2] sm:$0xff]  ;;  %v298_v8 = vld [vmem:[#allocation2 + $0x8] sm:$0xff]  ;;  %v877_v9 = vld [vmem:[%s1575_s5] ss:$0 sm:$0xff] }
  0x3a   :  { %264 = vmatpush.msrb.mxu0 %v132_v22  ;;  %375 = vmatpush.msrb.mxu2 %v321_v33  ;;  %v950_v22 = vmov 4.0   ;;  %v329_v24 = vld [vmem:[%s1574_s4] ss:$8 sm:$0x3]  ;;  %v349_v33 = vld [vmem:[%s1573_s3 + $0x78] sm:$0xff] }
  0x3b   :  { %284 = vmatpush.msrb.mxu1 %v148_v23  ;;  %395 = vmatpush.msrb.mxu3 %v322_v36  ;;  %880 = vrcp.f32 %v950_v22  ;;  %v368_v25 = vperm.slane %v329_v24, 0  ;;  %v337_v22 = vld [vmem:[%s1573_s3 + $0x18] sm:$0xff] }
  0x3c   :  { %265 = vmatpush.msrb.mxu0 %v131_v26  ;;  %376 = vmatpush.msrb.mxu2 %v319_v37 }
  0x3d   :  { %285 = vmatpush.msrb.mxu1 %v147_v27  ;;  %396 = vmatpush.msrb.mxu3 %v320_v40  ;;  %v369_v27 = vperm.slane %v329_v24, 1  ;;  %v364_v40 = vld [vmem:[%s1573_s3 + $0xf0] sm:$0xff] }
  0x3e   :  { %266 = vmatpush.msrb.mxu0 %v130_v30  ;;  %377 = vmatpush.msrb.mxu2 %v317_v41 }
  0x3f   :  { %286 = vmatpush.msrb.mxu1 %v146_v31  ;;  %397 = vmatpush.msrb.mxu3 %v318_v44  ;;  %v347_v44 = vld [vmem:[%s1573_s3 + $0x68] sm:$0xff] }
  0x40   :  { %267 = vmatpush.msrb.mxu0 %v129_v34  ;;  %378 = vmatpush.msrb.mxu2 %v315_v45  ;;  %v365_v34 = vld [vmem:[%s1573_s3 + $0xf8] sm:$0xff]  ;;  %v363_v45 = vld [vmem:[%s1573_s3 + $0xe8] sm:$0xff] }
  0x41   :  { %287 = vmatpush.msrb.mxu1 %v145_v35  ;;  %398 = vmatpush.msrb.mxu3 %v316_v48  ;;  %v881_v23 = vpop.eup %880  ;;  %v346_v48 = vld [vmem:[%s1573_s3 + $0x60] sm:$0xff] }
  0x42   :  { %268 = vmatpush.msrb.mxu0 %v128_v38  ;;  %379 = vmatpush.msrb.mxu2 %v313_v49  ;;  %v428_v26 = vmul.f32 4.0, %v881_v23  ;;  %v362_v49 = vld [vmem:[%s1573_s3 + $0xe0] sm:$0xff]  ;;  %vm432_vm1 = vweird.f32 %v881_v23 }
  0x43   :  { %288 = vmatpush.msrb.mxu1 %v144_v39  ;;  %399 = vmatpush.msrb.mxu3 %v314_v52  ;;  %v348_v39 = vld [vmem:[%s1573_s3 + $0x70] sm:$0xff] }
  0x44   :  { %269 = vmatpush.msrb.mxu0 %v127_v42  ;;  %380 = vmatpush.msrb.mxu2 %v311_v53  ;;  %v429_v31 = vsub.f32 1.0, %v428_v26  ;;  %v345_v53 = vld [vmem:[%s1573_s3 + $0x58] sm:$0xff]  ;;  %v336_v26 = vld [vmem:[%s1573_s3 + $0x10] sm:$0xff] }
  0x45   :  { %289 = vmatpush.msrb.mxu1 %v143_v43  ;;  %400 = vmatpush.msrb.mxu3 %v312_v58  ;;  %v360_v58 = vld [vmem:[%s1573_s3 + $0xd0] sm:$0xff] }
  0x46   :  { %270 = vmatpush.msrb.mxu0 %v126_v46  ;;  %381 = vmatpush.msrb.mxu2 %v309_v59  ;;  %v430_v41 = vmul.f32 %v881_v23, %v429_v31  ;;  %v351_v31 = vld [vmem:[%s1573_s3 + $0x88] sm:$0xff] }
  0x47   :  { %290 = vmatpush.msrb.mxu1 %v142_v47  ;;  %401 = vmatpush.msrb.mxu3 %v310_v60 }
  0x48   :  { %271 = vmatpush.msrb.mxu0 %v125_v50  ;;  %382 = vmatpush.msrb.mxu2 %v307_v61  ;;  %v431_v50 = vadd.f32 %v881_v23, %v430_v41 }
  0x49   :  { %291 = vmatpush.msrb.mxu1 %v141_v51  ;;  %402 = vmatpush.msrb.mxu3 %v308_v62  ;;  %v343_v62 = vld [vmem:[%s1573_s3 + $0x48] sm:$0xff] }
  0x4a   :  { %272 = vmatpush.msrb.mxu0 %v124_v54  ;;  %383 = vmatpush.msrb.mxu2 %v305_v63  ;;  %v361_v54 = vld [vmem:[%s1573_s3 + $0xd8] sm:$0xff]  ;;  %v1338_v59 = vsel %vm432_vm1, %v881_v23, %v431_v50  ;;  %v359_v63 = vld [vmem:[%s1573_s3 + $0xc8] sm:$0xff] }
  0x4b   :  { %292 = vmatpush.msrb.mxu1 %v140_v55  ;;  %273 = vmatmul.f32.vlgmr.msrb.gmra.mxu0 %v169_v56  ;;  %v353_v23 = vld [vmem:[%s1573_s3 + $0x98] sm:$0xff] }
  0x4c   :  { %293 = vmatmul.f32.vlgmr.msrb.gmra.mxu1 %v170_v57  ;;  %403 = vmatpush.msrb.mxu3 %v306_v0  ;;  %v344_v57 = vld [vmem:[%s1573_s3 + $0x50] sm:$0xff]  ;;  %v543_v50 = vld [vmem:[#allocation2 + $0x130] sm:$0xff] }
  0x4d   :  { %384 = vmatpush.msrb.mxu2 %v303_v1  ;;  %497 = vmatpush.msra.mxu0 %v349_v33  ;;  %v350_v33 = vld [vmem:[%s1573_s3 + $0x80] sm:$0xff] }
  0x4e   :  { %404 = vmatpush.msrb.mxu3 %v304_v2  ;;  %517 = vmatpush.msra.mxu1 %v365_v34  ;;  %v342_v2 = vld [vmem:[%s1573_s3 + $0x40] sm:$0xff] }
  0x4f   :  { %385 = vmatpush.msrb.mxu2 %v301_v3  ;;  %498 = vmatpush.msra.mxu0 %v348_v39  ;;  %v358_v3 = vld [vmem:[%s1573_s3 + $0xc0] sm:$0xff] }
  0x50   :  { %405 = vmatpush.msrb.mxu3 %v302_v4  ;;  %518 = vmatpush.msra.mxu1 %v364_v40  ;;  %v552_v39 = vld [vmem:[#allocation2 + $0x178] sm:$0xff]  ;;  %v549_v40 = vld [vmem:[#allocation2 + $0x160] sm:$0xff] }
  0x51   :  { %386 = vmatpush.msrb.mxu2 %v299_v5  ;;  %499 = vmatpush.msra.mxu0 %v347_v44  ;;  %v547_v44 = vld [vmem:[#allocation2 + $0x150] sm:$0xff] }
  0x52   :  { %406 = vmatpush.msrb.mxu3 %v300_v6  ;;  %519 = vmatpush.msra.mxu1 %v363_v45  ;;  %v341_v6 = vld [vmem:[%s1573_s3 + $0x38] sm:$0xff]  ;;  %v548_v45 = vld [vmem:[#allocation2 + $0x158] sm:$0xff] }
  0x53   :  { %387 = vmatpush.msrb.mxu2 %v297_v7  ;;  %500 = vmatpush.msra.mxu0 %v346_v48  ;;  %v357_v7 = vld [vmem:[%s1573_s3 + $0xb8] sm:$0xff]  ;;  %v545_v48 = vld [vmem:[#allocation2 + $0x140] sm:$0xff] }
  0x54   :  { %407 = vmatpush.msrb.mxu3 %v298_v8  ;;  %520 = vmatpush.msra.mxu1 %v362_v49  ;;  %v546_v49 = vld [vmem:[#allocation2 + $0x148] sm:$0xff] }
  0x55   :  { %501 = vmatpush.msra.mxu0 %v345_v53 }
  0x56   :  { %521 = vmatpush.msra.mxu1 %v361_v54  ;;  %629 = vmatpush.msra.mxu3 %v552_v39 }
  0x57   :  { %502 = vmatpush.msra.mxu0 %v344_v57 }
  0x58   :  { %522 = vmatpush.msra.mxu1 %v360_v58 }
  0x59   :  { %503 = vmatpush.msra.mxu0 %v343_v62 }
  0x5a   :  { %523 = vmatpush.msra.mxu1 %v359_v63 }
  0x5b   :  { %504 = vmatpush.msra.mxu0 %v342_v2 }
  0x5c   :  { %524 = vmatpush.msra.mxu1 %v358_v3 }
  0x5d   :  { %505 = vmatpush.msra.mxu0 %v341_v6 }
  0x5e   :  { %525 = vmatpush.msra.mxu1 %v357_v7 }
  0xae   :  { %v194_v10 = vpop.f32.mrf.mxu0 }
  0xaf   :  { %v195_v11 = vadd.f32 %v877_v9, %v194_v10  ;;  %v340_v10 = vld [vmem:[%s1573_s3 + $0x30] sm:$0xff] }
  0xb0   :  { %506 = vmatpush.msra.mxu0 %v340_v10 }
  0xb1   :  { %v214_v12 = vpop.f32.mrf.mxu1 }
  0xb2   :  { %v215_v13 = vadd.f32 %v214_v12, %v195_v11  ;;  %v234_v14 = vpop.f32.mrf.mxu2  ;;  %v356_v11 = vld [vmem:[%s1573_s3 + $0xb0] sm:$0xff] }
  0xb3   :  { %526 = vmatpush.msra.mxu1 %v356_v11 }
  0xb4   :  { %v235_v15 = vadd.f32 %v234_v14, %v215_v13  ;;  %v339_v14 = vld [vmem:[%s1573_s3 + $0x28] sm:$0xff] }
  0xb5   :  { %v254_v16 = vpop.f32.mrf.mxu3  ;;  %507 = vmatpush.msra.mxu0 %v339_v14 }
  0xb6   :  { %v255_v17 = vadd.f32 %v254_v16, %v235_v15  ;;  %v355_v15 = vld [vmem:[%s1573_s3 + $0xa8] sm:$0xff] }
  0xb7   :  { %527 = vmatpush.msra.mxu1 %v355_v15 }
  0xc8   :  { %v274_v18 = vpop.f32.mrf.mxu0 }
  0xc9   :  { %v294_v19 = vpop.f32.mrf.mxu1  ;;  %v275_v20 = vadd.f32 %v274_v18, %v255_v17  ;;  %v338_v18 = vld [vmem:[%s1573_s3 + $0x20] sm:$0xff] }
  0xca   :  { %508 = vmatpush.msra.mxu0 %v338_v18 }
  0xcb   :  { %v295_v21 = vadd.f32 %v294_v19, %v275_v20  ;;  %v354_v19 = vld [vmem:[%s1573_s3 + $0xa0] sm:$0xff] }
  0xcc   :  { %528 = vmatpush.msra.mxu1 %v354_v19  ;;  %509 = vmatpush.msra.mxu0 %v337_v22  ;;  %v541_v19 = vld [vmem:[#allocation2 + $0x120] sm:$0xff]  ;;  %v540_v22 = vld [vmem:[#allocation2 + $0x118] sm:$0xff] }
  0xcd   :  { %388 = vmatmul.f32.vlgmr.msrb.gmra.mxu2 %v295_v21  ;;  %408 = vmatmul.f32.vlgmr.msrb.gmra.mxu3 %v295_v21 }
  0xce   :  { %529 = vmatpush.msra.mxu1 %v353_v23  ;;  %510 = vmatpush.msra.mxu0 %v336_v26  ;;  %v538_v23 = vld [vmem:[#allocation2 + $0x108] sm:$0xff] }
 0x150   :  { %v389_v28 = vpop.f32.mrf.mxu2  ;;  %v409_v29 = vpop.f32.mrf.mxu3 }
 0x151   :  { %v390_v30 = vadd.f32 %v389_v28, %v368_v25  ;;  %v410_v32 = vadd.f32 %v409_v29, %v369_v27  ;;  %v352_v27 = vld [vmem:[%s1573_s3 + $0x90] sm:$0xff]  ;;  %v335_v28 = vld [vmem:[%s1573_s3 + $0x8] sm:$0xff] }
 0x152   :  { %530 = vmatpush.msra.mxu1 %v352_v27  ;;  %511 = vmatpush.msra.mxu0 %v335_v28  ;;  %v865_v28 = vld [vmem:[%s1574_s4 + $0x3] ss:$8 sm:$0x3] }
 0x153   :  { %v413_v35 = vsel %vm412_vm0, %v390_v30, 0.0  ;;  %v420_v36 = vsel %vm412_vm0, %v410_v32, 0.0 }
 0x154   :  { %v414_v37 = vrot.slane %v413_v35, 4  ;;  %v421_v38 = vrot.slane %v420_v36, 4  ;;  %531 = vmatpush.msra.mxu1 %v351_v31 }
 0x156   :  { %v415_v42 = vadd.f32 %v414_v37, %v413_v35  ;;  %v422_v43 = vadd.f32 %v421_v38, %v420_v36  ;;  %532 = vmatpush.msra.mxu1 %v350_v33  ;;  %v551_v38 = vld [vmem:[#allocation2 + $0x170] sm:$0xff] }
 0x157   :  { %609 = vmatpush.msra.mxu2 %v551_v38 }
 0x158   :  { %v416_v46 = vrot.slane %v415_v42, 2  ;;  %v423_v47 = vrot.slane %v422_v43, 2 }
 0x159   :  { %610 = vmatpush.msra.mxu2 %v549_v40 }
 0x15a   :  { %v417_v51 = vadd.f32 %v416_v46, %v415_v42  ;;  %v424_v52 = vadd.f32 %v423_v47, %v422_v43  ;;  %v550_v43 = vld [vmem:[#allocation2 + $0x168] sm:$0xff] }
 0x15b   :  { %630 = vmatpush.msra.mxu3 %v550_v43  ;;  %611 = vmatpush.msra.mxu2 %v547_v44 }
 0x15c   :  { %v418_v55 = vrot.slane %v417_v51, 1  ;;  %v425_v56 = vrot.slane %v424_v52, 1 }
 0x15d   :  { %631 = vmatpush.msra.mxu3 %v548_v45  ;;  %612 = vmatpush.msra.mxu2 %v545_v48  ;;  %v572_v45 = vld [vmem:[%s1573_s3 + $0x168] sm:$0xff] }
 0x15e   :  { %v419_v60 = vadd.f32 %v418_v55, %v417_v51  ;;  %v426_v61 = vadd.f32 %v425_v56, %v424_v52  ;;  %v544_v51 = vld [vmem:[#allocation2 + $0x138] sm:$0xff] }
 0x15f   :  { %632 = vmatpush.msra.mxu3 %v546_v49  ;;  %613 = vmatpush.msra.mxu2 %v543_v50  ;;  %v571_v49 = vld [vmem:[%s1573_s3 + $0x160] sm:$0xff] }
 0x160   :  { %v434_v0 = vmul.f32 %v1338_v59, %v419_v60  ;;  %v435_v1 = vmul.f32 %v1338_v59, %v426_v61  ;;  %v863_v61 = vld [vmem:[%s1574_s4 + $0x1] ss:$8 sm:$0x3] }
 0x161   :  { %633 = vmatpush.msra.mxu3 %v544_v51  ;;  %v481_v2 = vperm.slane %v863_v61, 0  ;;  %v482_v7 = vperm.slane %v863_v61, 1  ;;  %614 = vmatpush.msra.mxu2 %v541_v19  ;;  %v587_v50 = vld [vmem:[%s1573_s3 + $0x1e0] sm:$0xff] }
 0x162   :  { %v1354_v4 = vsub.f32 %v390_v30, %v434_v0  ;;  %v1356_v5 = vsub.f32 %v410_v32, %v435_v1  ;;  %v334_v32 = vld [vmem:[%s1573_s3] sm:$0xff] }
 0x163   :  { %512 = vmatpush.msra.mxu0 %v334_v32  ;;  %v864_v1 = vld [vmem:[%s1574_s4 + $0x2] ss:$8 sm:$0x3] }
 0x164   :  { %v438_v8 = vmul.f32 %v1354_v4, %v1354_v4  ;;  %v439_v9 = vmul.f32 %v1356_v5, %v1356_v5  ;;  %v488_v10 = vperm.slane %v864_v1, 0 }
 0x166   :  { %v440_v12 = vsel %vm412_vm0, %v438_v8, 0.0  ;;  %v447_v13 = vsel %vm412_vm0, %v439_v9, 0.0 }
 0x167   :  { %v441_v16 = vrot.slane %v440_v12, 4  ;;  %v448_v17 = vrot.slane %v447_v13, 4 }
 0x169   :  { %v442_v20 = vadd.f32 %v441_v16, %v440_v12  ;;  %v449_v21 = vadd.f32 %v448_v17, %v447_v13  ;;  %v489_v12 = vperm.slane %v864_v1, 1 }
 0x16b   :  { %v443_v24 = vrot.slane %v442_v20, 2  ;;  %v450_v25 = vrot.slane %v449_v21, 2 }
 0x16d   :  { %v444_v29 = vadd.f32 %v443_v24, %v442_v20  ;;  %v451_v30 = vadd.f32 %v450_v25, %v449_v21  ;;  %v542_v20 = vld [vmem:[#allocation2 + $0x128] sm:$0xff]  ;;  %v539_v21 = vld [vmem:[#allocation2 + $0x110] sm:$0xff] }
 0x16e   :  { %634 = vmatpush.msra.mxu3 %v542_v20  ;;  %615 = vmatpush.msra.mxu2 %v539_v21  ;;  %v563_v20 = vld [vmem:[%s1573_s3 + $0x120] sm:$0xff] }
 0x16f   :  { %v445_v34 = vrot.slane %v444_v29, 1  ;;  %v452_v35 = vrot.slane %v451_v30, 1  ;;  %v579_v21 = vld [vmem:[%s1573_s3 + $0x1a0] sm:$0xff] }
 0x170   :  { %635 = vmatpush.msra.mxu3 %v540_v22 }
 0x171   :  { %v446_v36 = vadd.f32 %v445_v34, %v444_v29  ;;  %v453_v37 = vadd.f32 %v452_v35, %v451_v30  ;;  %v593_v29 = vperm.slane %v865_v28, 0  ;;  %v594_v30 = vperm.slane %v865_v28, 1  ;;  %v574_v35 = vld [vmem:[%s1573_s3 + $0x178] sm:$0xff]  ;;  %v577_v28 = vld [vmem:[%s1573_s3 + $0x190] sm:$0xff] }
 0x172   :  { %636 = vmatpush.msra.mxu3 %v538_v23  ;;  %v562_v23 = vld [vmem:[%s1573_s3 + $0x118] sm:$0xff] }
 0x173   :  { %v454_v41 = vmul.f32 %v446_v36, %v1338_v59  ;;  %v455_v42 = vmul.f32 %v453_v37, %v1338_v59  ;;  %v590_v36 = vld [vmem:[%s1573_s3 + $0x1f8] sm:$0xff] }
 0x174   :  { %738 = vmatpush.msrb.mxu3 %v590_v36 }
 0x175   :  { %v456_v46 = vadd.f32 1e-05, %v454_v41  ;;  %v457_v47 = vadd.f32 1e-05, %v455_v42  ;;  %v573_v41 = vld [vmem:[%s1573_s3 + $0x170] sm:$0xff] }
 0x176   :  { %v589_v42 = vld [vmem:[%s1573_s3 + $0x1f0] sm:$0xff] }
 0x177   :  { %882 = vrsqrt.f32 %v456_v46  ;;  %vm464_vm4 = vweird.f32 %v456_v46  ;;  %vm474_vm6 = vweird.f32 %v457_v47  ;;  %739 = vmatpush.msrb.mxu3 %v589_v42 }
 0x178   :  { %884 = vrsqrt.f32 %v457_v47 }
 0x17d   :  { %v883_v52 = vpop.eup %882 }
 0x17e   :  { %v885_v53 = vpop.eup %884  ;;  %v459_v54 = vmul.f32 %v883_v52, %v456_v46  ;;  %vm465_vm2 = vweird.f32 %v883_v52  ;;  %v588_v46 = vld [vmem:[%s1573_s3 + $0x1e8] sm:$0xff] }
 0x17f   :  { %v469_v55 = vmul.f32 %v885_v53, %v457_v47  ;;  %vm475_vm3 = vweird.f32 %v885_v53  ;;  %vm466_vm5 = vmor %vm464_vm4, %vm465_vm2  ;;  %740 = vmatpush.msrb.mxu3 %v588_v46 }
 0x180   :  { %v460_v56 = vmul.f32 %v883_v52, %v459_v54  ;;  %vm476_vm7 = vmor %vm474_vm6, %vm475_vm3  ;;  %v586_v54 = vld [vmem:[%s1573_s3 + $0x1d8] sm:$0xff] }
 0x181   :  { %v470_v57 = vmul.f32 %v885_v53, %v469_v55  ;;  %741 = vmatpush.msrb.mxu3 %v587_v50 }
 0x182   :  { %v461_v58 = vmul.f32 0.5, %v460_v56 }
 0x183   :  { %v471_v60 = vmul.f32 0.5, %v470_v57  ;;  %742 = vmatpush.msrb.mxu3 %v586_v54  ;;  %v569_v57 = vld [vmem:[%s1573_s3 + $0x150] sm:$0xff] }
 0x184   :  { %v462_v62 = vsub.f32 1.5, %v461_v58  ;;  %v585_v58 = vld [vmem:[%s1573_s3 + $0x1d0] sm:$0xff] }
 0x185   :  { %v472_v63 = vsub.f32 1.5, %v471_v60  ;;  %743 = vmatpush.msrb.mxu3 %v585_v58 }
 0x186   :  { %v463_v0 = vmul.f32 %v883_v52, %v462_v62  ;;  %v568_v62 = vld [vmem:[%s1573_s3 + $0x148] sm:$0xff] }
 0x187   :  { %v473_v3 = vmul.f32 %v885_v53, %v472_v63  ;;  %v584_v63 = vld [vmem:[%s1573_s3 + $0x1c8] sm:$0xff] }
 0x188   :  { %v467_v6 = vsel %vm466_vm5, %v883_v52, %v463_v0  ;;  %744 = vmatpush.msrb.mxu3 %v584_v63 }
 0x189   :  { %v478_v8 = vmul.f32 %v467_v6, %v1354_v4  ;;  %v477_v9 = vsel %vm476_vm7, %v885_v53, %v473_v3  ;;  %v537_v4 = vld [vmem:[#allocation2 + $0x100] sm:$0xff]  ;;  %v570_v53 = vld [vmem:[%s1573_s3 + $0x158] sm:$0xff]  ;;  %v583_v3 = vld [vmem:[%s1573_s3 + $0x1c0] sm:$0xff] }
 0x18a   :  { %v479_v11 = vmul.f32 %v477_v9, %v1356_v5  ;;  %616 = vmatpush.msra.mxu2 %v537_v4  ;;  %v878_v5 = vld [vmem:[%s1575_s5 + $0x1] ss:$0 sm:$0xff]  ;;  %745 = vmatpush.msrb.mxu3 %v583_v3  ;;  %v582_v9 = vld [vmem:[%s1573_s3 + $0x1b8] sm:$0xff] }
 0x18b   :  { %v485_v13 = vmul.f32 %v481_v2, %v478_v8  ;;  %v567_v2 = vld [vmem:[%s1573_s3 + $0x140] sm:$0xff]  ;;  %v566_v8 = vld [vmem:[%s1573_s3 + $0x138] sm:$0xff] }
 0x18c   :  { %v486_v14 = vmul.f32 %v482_v7, %v479_v11  ;;  %718 = vmatpush.msrb.mxu2 %v574_v35  ;;  %746 = vmatpush.msrb.mxu3 %v582_v9 }
 0x18d   :  { %v492_v15 = vadd.f32 %v488_v10, %v485_v13  ;;  %v581_v13 = vld [vmem:[%s1573_s3 + $0x1b0] sm:$0xff] }
 0x18e   :  { %v493_v16 = vadd.f32 %v489_v12, %v486_v14  ;;  %719 = vmatpush.msrb.mxu2 %v573_v41  ;;  %v565_v12 = vld [vmem:[%s1573_s3 + $0x130] sm:$0xff]  ;;  %747 = vmatpush.msrb.mxu3 %v581_v13 }
 0x18f   :  { %v494_v17 = vmax.f32 %v492_v15, 0.0 }
 0x190   :  { %v495_v18 = vmax.f32 %v493_v16, 0.0  ;;  %720 = vmatpush.msrb.mxu2 %v572_v45  ;;  %v564_v16 = vld [vmem:[%s1573_s3 + $0x128] sm:$0xff] }
 0x191   :  { %513 = vmatmul.f32.vlgmr.msra.gmra.mxu0 %v494_v17  ;;  %v580_v17 = vld [vmem:[%s1573_s3 + $0x1a8] sm:$0xff] }
 0x192   :  { %533 = vmatmul.f32.vlgmr.msra.gmra.mxu1 %v495_v18  ;;  %721 = vmatpush.msrb.mxu2 %v571_v49 }
 0x193   :  { %748 = vmatpush.msrb.mxu3 %v580_v17 }
 0x194   :  { %722 = vmatpush.msrb.mxu2 %v570_v53 }
 0x195   :  { %749 = vmatpush.msrb.mxu3 %v579_v21 }
 0x196   :  { %723 = vmatpush.msrb.mxu2 %v569_v57 }
 0x198   :  { %724 = vmatpush.msrb.mxu2 %v568_v62 }
 0x19a   :  { %725 = vmatpush.msrb.mxu2 %v567_v2 }
 0x19c   :  { %726 = vmatpush.msrb.mxu2 %v566_v8 }
 0x19e   :  { %727 = vmatpush.msrb.mxu2 %v565_v12  ;;  %v806_v12 = vld [vmem:[#allocation4] sm:$0x3f] }
 0x19f   :  { %870 = vmatpush.xpose.msk.msrb.mxu0 %vm597_vm8, %v806_v12 }
 0x1a0   :  { %728 = vmatpush.msrb.mxu2 %v564_v16 }
 0x1a2   :  { %729 = vmatpush.msrb.mxu2 %v563_v20  ;;  %871 = vmatmul.msk.f32.vlgmr.msrb.gmra.mxu0 %vm597_vm8, %v806_v12 }
 0x1a4   :  { %730 = vmatpush.msrb.mxu2 %v562_v23 }
 0x20e   :  { %v514_v24 = vpop.f32.mrf.mxu0 }
 0x20f   :  { %v515_v25 = vadd.f32 %v878_v5, %v514_v24  ;;  %v534_v26 = vpop.f32.mrf.mxu1  ;;  %v578_v5 = vld [vmem:[%s1573_s3 + $0x198] sm:$0xff] }
 0x210   :  { %750 = vmatpush.msrb.mxu3 %v578_v5 }
 0x211   :  { %v1425_v27 = vadd.f32 %v534_v26, %v515_v25  ;;  %v561_v26 = vld [vmem:[%s1573_s3 + $0x110] sm:$0xff] }
 0x212   :  { %731 = vmatpush.msrb.mxu2 %v561_v26  ;;  %751 = vmatpush.msrb.mxu3 %v577_v28 }
 0x213   :  { %868 = vmatmul.msk.f32.vlgmr.msra.gmra.mxu2 %vm597_vm8, %v1425_v27  ;;  %869 = vmatmul.msk.f32.vlgmr.msra.gmra.mxu3 %vm597_vm8, %v1425_v27  ;;  %vm839_vm8 = vcmask 46080  }
 0x296   :  { %v618_v31 = vpop.f32.mrf.mxu2  ;;  %v638_v32 = vpop.f32.mrf.mxu3 }
 0x297   :  { %v619_v33 = vadd.f32 %v618_v31, %v593_v29  ;;  %v639_v34 = vadd.f32 %v638_v32, %v594_v30  ;;  %v560_v29 = vld [vmem:[%s1573_s3 + $0x108] sm:$0xff] }
 0x298   :  { %v576_v32 = vld [vmem:[%s1573_s3 + $0x188] sm:$0xff]  ;;  %732 = vmatpush.msrb.mxu2 %v560_v29 }
 0x299   :  { %v641_v37 = vsel %vm412_vm0, %v619_v33, 0.0  ;;  %v648_v38 = vsel %vm412_vm0, %v639_v34, 0.0  ;;  %752 = vmatpush.msrb.mxu3 %v576_v32 }
 0x29a   :  { %v642_v39 = vrot.slane %v641_v37, 4  ;;  %v649_v40 = vrot.slane %v648_v38, 4 }
 0x29c   :  { %v643_v43 = vadd.f32 %v642_v39, %v641_v37  ;;  %v650_v44 = vadd.f32 %v649_v40, %v648_v38 }
 0x29e   :  { %v644_v47 = vrot.slane %v643_v43, 2  ;;  %v651_v48 = vrot.slane %v650_v44, 2 }
 0x2a0   :  { %v645_v51 = vadd.f32 %v644_v47, %v643_v43  ;;  %v652_v52 = vadd.f32 %v651_v48, %v650_v44 }
 0x2a2   :  { %v646_v55 = vrot.slane %v645_v51, 1  ;;  %v653_v56 = vrot.slane %v652_v52, 1 }
 0x2a4   :  { %v647_v60 = vadd.f32 %v646_v55, %v645_v51  ;;  %v654_v61 = vadd.f32 %v653_v56, %v652_v52  ;;  %v866_v51 = vld [vmem:[%s1574_s4 + $0x4] ss:$8 sm:$0x3]  ;;  %v867_v55 = vld [vmem:[%s1574_s4 + $0x5] ss:$8 sm:$0x3] }
 0x2a5   :  { %v702_v56 = vperm.slane %v866_v51, 0  ;;  %v709_v63 = vperm.slane %v867_v55, 0 }
 0x2a6   :  { %v655_v0 = vmul.f32 %v647_v60, %v1338_v59  ;;  %v656_v1 = vmul.f32 %v654_v61, %v1338_v59  ;;  %v703_v60 = vperm.slane %v866_v51, 1 }
 0x2a8   :  { %v1486_v6 = vsub.f32 %v619_v33, %v655_v0  ;;  %v1488_v7 = vsub.f32 %v639_v34, %v656_v1  ;;  %v559_v33 = vld [vmem:[%s1573_s3 + $0x100] sm:$0xff]  ;;  %v710_v1 = vperm.slane %v867_v55, 1 }
 0x2a9   :  { %v575_v34 = vld [vmem:[%s1573_s3 + $0x180] sm:$0xff]  ;;  %733 = vmatpush.msrb.mxu2 %v559_v33 }
 0x2aa   :  { %v659_v10 = vmul.f32 %v1486_v6, %v1486_v6  ;;  %v660_v11 = vmul.f32 %v1488_v7, %v1488_v7  ;;  %753 = vmatpush.msrb.mxu3 %v575_v34 }
 0x2ac   :  { %v661_v14 = vsel %vm412_vm0, %v659_v10, 0.0  ;;  %v668_v15 = vsel %vm412_vm0, %v660_v11, 0.0 }
 0x2ad   :  { %v662_v18 = vrot.slane %v661_v14, 4  ;;  %v669_v19 = vrot.slane %v668_v15, 4 }
 0x2af   :  { %v663_v22 = vadd.f32 %v662_v18, %v661_v14  ;;  %v670_v4 = vadd.f32 %v669_v19, %v668_v15  ;;  %v774_v18 = vmul.f32 %v1425_v27, %v1425_v27 }
 0x2b1   :  { %v664_v24 = vrot.slane %v663_v22, 2  ;;  %v671_v25 = vrot.slane %v670_v4, 2  ;;  %v775_v19 = vsel %vm759_vm15, %v774_v18, 0.0 }
 0x2b3   :  { %v665_v30 = vadd.f32 %v664_v24, %v663_v22  ;;  %v672_v31 = vadd.f32 %v671_v25, %v670_v4 }
 0x2b5   :  { %v666_v35 = vrot.slane %v665_v30, 1  ;;  %v673_v36 = vrot.slane %v672_v31, 1 }
 0x2b7   :  { %v667_v37 = vadd.f32 %v666_v35, %v665_v30  ;;  %v674_v38 = vadd.f32 %v673_v36, %v672_v31  ;;  %v827_v36 = vpop.f32.mrf.mxu0 }
 0x2b9   :  { %v675_v39 = vmul.f32 %v667_v37, %v1338_v59  ;;  %v676_v40 = vmul.f32 %v674_v38, %v1338_v59  ;;  %v830_v37 = vlaneseq }
 0x2bb   :  { %v677_v41 = vadd.f32 1e-05, %v675_v39  ;;  %v678_v42 = vadd.f32 1e-05, %v676_v40 }
 0x2bd   :  { %886 = vrsqrt.f32 %v677_v41  ;;  %vm685_vm11 = vweird.f32 %v677_v41  ;;  %vm695_vm13 = vweird.f32 %v678_v42 }
 0x2be   :  { %888 = vrsqrt.f32 %v678_v42 }
 0x2c3   :  { %v887_v43 = vpop.eup %886 }
 0x2c4   :  { %v889_v44 = vpop.eup %888  ;;  %v680_v45 = vmul.f32 %v887_v43, %v677_v41  ;;  %vm686_vm9 = vweird.f32 %v887_v43  ;;  %v835_v41 = vsub.f32 1.0, %v827_v36 }
 0x2c5   :  { %v690_v46 = vmul.f32 %v889_v44, %v678_v42  ;;  %vm696_vm10 = vweird.f32 %v889_v44  ;;  %vm687_vm12 = vmor %vm685_vm11, %vm686_vm9  ;;  %vm843_vm9 = vcmask 1045504  }
 0x2c6   :  { %v681_v47 = vmul.f32 %v887_v43, %v680_v45  ;;  %vm697_vm14 = vmor %vm695_vm13, %vm696_vm10 }
 0x2c7   :  { %v691_v48 = vmul.f32 %v889_v44, %v690_v46  ;;  %v836_v46 = vand.u32 2147483647, %v835_v41 }
 0x2c8   :  { %v682_v49 = vmul.f32 0.5, %v681_v47  ;;  %v837_v47 = vand.u32 2147483647, %v827_v36 }
 0x2c9   :  { %v692_v50 = vmul.f32 0.5, %v691_v48 }
 0x2ca   :  { %v683_v52 = vsub.f32 1.5, %v682_v49 }
 0x2cb   :  { %v693_v53 = vsub.f32 1.5, %v692_v50 }
 0x2cc   :  { %v684_v54 = vmul.f32 %v887_v43, %v683_v52 }
 0x2cd   :  { %v694_v57 = vmul.f32 %v889_v44, %v693_v53 }
 0x2ce   :  { %v688_v58 = vsel %vm687_vm12, %v887_v43, %v684_v54  ;;  %v831_v43 = vshrl.u32 %v830_v37, 7 }
 0x2cf   :  { %v699_v61 = vmul.f32 %v688_v58, %v1486_v6  ;;  %v698_v62 = vsel %vm697_vm14, %v889_v44, %v694_v57  ;;  %v879_v6 = vld [vmem:[%s1575_s5 + $0x2] ss:$0 sm:$0xff]  ;;  %v833_v44 = vand.u32 127, %v830_v37 }
 0x2d0   :  { %v700_v0 = vmul.f32 %v698_v62, %v1488_v7 }
 0x2d1   :  { %v706_v2 = vmul.f32 %v702_v56, %v699_v61  ;;  %vm834_vm7 = vcmp.eq.s32.totalorder %v831_v43, %v833_v44  ;;  %vm851_vm10 = vcmp.eq.s32.totalorder %v833_v44, 0  ;;  %vm853_vm11 = vcmp.eq.s32.totalorder %v833_v44, 1 }
 0x2d2   :  { %v707_v3 = vmul.f32 %v703_v60, %v700_v0  ;;  %v838_v48 = vsel %vm834_vm7, %v836_v46, %v837_v47 }
 0x2d3   :  { %v713_v8 = vadd.f32 %v709_v63, %v706_v2  ;;  %v840_v49 = vsel %vm839_vm8, %v838_v48, 0.0 }
 0x2d4   :  { %v714_v9 = vadd.f32 %v710_v1, %v707_v3 }
 0x2d5   :  { %v715_v10 = vmax.f32 %v713_v8, 0.0 }
 0x2d6   :  { %v716_v11 = vmax.f32 %v714_v9, 0.0 }
 0x2d7   :  { %734 = vmatmul.f32.vlgmr.msrb.gmra.mxu2 %v715_v10 }
 0x2d8   :  { %754 = vmatmul.f32.vlgmr.msrb.gmra.mxu3 %v716_v11 }
 0x35a   :  { %v735_v13 = vpop.f32.mrf.mxu2 }
 0x35b   :  { %v736_v7 = vadd.f32 %v879_v6, %v735_v13  ;;  %v755_v14 = vpop.f32.mrf.mxu3 }
 0x35d   :  { %v756_v15 = vadd.f32 %v755_v14, %v736_v7 }
 0x35f   :  { %v758_v16 = vmul.f32 %v756_v15, %v756_v15 }
 0x361   :  { %v760_v17 = vsel %vm759_vm15, %v758_v16, 0.0 }
 0x362   :  { %761 = vadd.xlane.f32.xlu0 %v760_v17 }
 0x36a   :  { %776 = vadd.xlane.f32.xlu0 %v775_v19 }
 0x3d5   :  { %v762_v20 = vpop.xlane.xlu0 %761 }
 0x3d6   :  { %v763_v21 = vmax.f32 %v762_v20, 1e-24 }
 0x3d8   :  { %890 = vrsqrt.f32 %v763_v21  ;;  %vm770_vm2 = vweird.f32 %v763_v21 }
 0x3dd   :  { %v777_v22 = vpop.xlane.xlu0 %776 }
 0x3de   :  { %v891_v4 = vpop.eup %890  ;;  %v778_v23 = vmax.f32 %v777_v22, 1e-24 }
 0x3df   :  { %v765_v5 = vmul.f32 %v891_v4, %v763_v21  ;;  %vm771_vm1 = vweird.f32 %v891_v4 }
 0x3e0   :  { %892 = vrsqrt.f32 %v778_v23  ;;  %vm772_vm4 = vmor %vm770_vm2, %vm771_vm1  ;;  %vm785_vm5 = vweird.f32 %v778_v23 }
 0x3e1   :  { %v766_v24 = vmul.f32 %v891_v4, %v765_v5 }
 0x3e3   :  { %v767_v25 = vmul.f32 0.5, %v766_v24 }
 0x3e5   :  { %v768_v28 = vsub.f32 1.5, %v767_v25 }
 0x3e6   :  { %v893_v26 = vpop.eup %892 }
 0x3e7   :  { %v780_v29 = vmul.f32 %v893_v26, %v778_v23  ;;  %v769_v32 = vmul.f32 %v891_v4, %v768_v28  ;;  %vm786_vm3 = vweird.f32 %v893_v26 }
 0x3e8   :  { %vm787_vm6 = vmor %vm785_vm5, %vm786_vm3 }
 0x3e9   :  { %v781_v30 = vmul.f32 %v893_v26, %v780_v29  ;;  %v773_v34 = vsel %vm772_vm4, %v891_v4, %v769_v32 }
 0x3ea   :  { %v789_v39 = vmul.f32 %v773_v34, %v756_v15 }
 0x3eb   :  { %v782_v31 = vmul.f32 0.5, %v781_v30 }
 0x3ed   :  { %v783_v33 = vsub.f32 1.5, %v782_v31 }
 0x3ef   :  { %v784_v35 = vmul.f32 %v893_v26, %v783_v33 }
 0x3f1   :  { %v788_v38 = vsel %vm787_vm6, %v893_v26, %v784_v35 }
 0x3f2   :  { %v790_v40 = vmul.f32 %v788_v38, %v1425_v27 }
 0x3f4   :  { %v791_v42 = vmul.f32 %v790_v40, %v789_v39 }
 0x3f6   :  { %v792_v45 = vsel %vm759_vm15, %v791_v42, 0.0 }
 0x3f7   :  { %793 = vadd.xlane.f32.xlu1 %v792_v45 }
 0x3ff   :  { %841 = vadd.xlane.f32.xlu1 %v840_v49 }
 0x46a   :  { %v794_v50 = vpop.xlane.xlu1 %793 }
 0x46b   :  { %v795_v51 = vmul.f32 2.0, %v794_v50 }
 0x46d   :  { %v796_v52 = vsub.f32 2.0, %v795_v51 }
 0x46f   :  { %v797_v53 = vmul.f32 2.0, %v796_v52 }
 0x471   :  { %v798_v27 = vsel %vm412_vm0, %v797_v53, 0.0 }
 0x472   :  { %v799_v54 = vrot.slane %v798_v27, 4  ;;  %v842_v55 = vpop.xlane.xlu1 %841 }
 0x473   :  { %v844_v56 = vsel %vm843_vm9, %v842_v55, 0.0 }
 0x474   :  { %v800_v57 = vadd.f32 %v799_v54, %v798_v27  ;;  %v845_v58 = vrot.slane %v844_v56, 4 }
 0x476   :  { %v801_v60 = vrot.slane %v800_v57, 2  ;;  %v846_v61 = vadd.f32 %v845_v58, %v844_v56 }
 0x478   :  { %v802_v62 = vadd.f32 %v801_v60, %v800_v57  ;;  %v847_v63 = vrot.slane %v846_v61, 2 }
 0x47a   :  { %v803_v0 = vrot.slane %v802_v62, 1  ;;  %v848_v1 = vadd.f32 %v847_v63, %v846_v61 }
 0x47c   :  { %v804_v2 = vadd.f32 %v803_v0, %v802_v62  ;;  %v849_v3 = vrot.slane %v848_v1, 1 }
 0x47e   :  { %v805_v8 = vmul.f32 %v804_v2, %v1338_v59  ;;  %v850_v9 = vadd.f32 %v849_v3, %v848_v1 }
 0x480   :  { %v852_v10 = vsel %vm851_vm10, %v805_v8, 0.0  ;;  %v854_v11 = vsel %vm853_vm11, %v850_v9, 0.0 }
 0x481   :  { %v855_v12 = vadd.f32 %v854_v11, %v852_v10 }
 0x483   :  { %856 = vst [vmem:[%s1577_s7] sm:$0x1] %v855_v12 }
 0x484   :  { %861 = vsyncpa [#allocation3], 1 }
 0x485   :  { %862 = vsyncpa [#allocation5], 1 }

</bundles_post_ra>
